<compile_context>
chip_gen: v6e
topology: v6e:2x2x1
jax: 0.10.0
libtpu: 0.0.40
codegen_flags: <defaults>
</compile_context>

<pallas_src>
import jax
import jax.numpy as jnp
from jax.experimental import pallas as pl
from jax.experimental.pallas import tpu as pltpu

N, IN, OUT = 8, 3, 8   # shapes implied by x1=randn(8,3), Linear(3, 8)
KAUG = IN + 1          # augmented K: weight rows + bias row


def _linear_kernel(x_ref, w_ref, o_ref):
    # x_ref: (N, IN)           -- activations
    # w_ref: (KAUG, OUT)       -- rows 0..IN-1 = weight.T, row IN = bias
    # o_ref: (N, OUT)
    x = x_ref[...]
    w = w_ref[...]
    # Bias row broadcast down the sublane axis (stride-0 style, cheap).
    acc = jnp.broadcast_to(w[IN:IN + 1, :], (N, OUT))
    # Unrolled K=3 multiply-add on the VPU: (N,1) column of x (lane-broadcast)
    # times (1,OUT) row of W (sublane-broadcast).  No MXU push/pop, no
    # relayout, single f32 accumulate chain.
    for k in range(IN):
        acc = acc + x[:, k:k + 1] * w[k:k + 1, :]
    o_ref[...] = acc.astype(o_ref.dtype)


def fold_params(weight, bias):
    """One-time parameter prep: W_aug = [weight.T ; bias] of shape (IN+1, OUT)."""
    return jnp.concatenate([weight.T, bias.reshape(1, OUT)], axis=0)


def model_forward(x1, w_aug):
    """Forward: (x1 @ weight.T + bias) as (1, N, OUT); w_aug from fold_params."""
    cost = pl.CostEstimate(
        flops=2 * N * IN * OUT,
        transcendentals=0,
        bytes_accessed=(N * IN + KAUG * OUT + N * OUT) * 4,
    )
    out = pl.pallas_call(
        _linear_kernel,
        out_shape=jax.ShapeDtypeStruct((N, OUT), jnp.float32),
        in_specs=[
            pl.BlockSpec((N, IN), lambda: (0, 0)),
            pl.BlockSpec((KAUG, OUT), lambda: (0, 0)),
        ],
        out_specs=pl.BlockSpec((N, OUT), lambda: (0, 0)),
        compiler_params=pltpu.CompilerParams(
            vmem_limit_bytes=512 * 1024,  # <1 KiB working set; don't hold default scoped VMEM
        ),
        cost_estimate=cost,
    )(x1, w_aug)
    # unsqueeze(0) + cat([.], dim=0) of a single tensor == expand leading dim.
    return out[None, ...]


def init_params(key):
    # Deterministic init mimicking torch.nn.Linear(3, 8): U(-1/sqrt(fan_in), 1/sqrt(fan_in))
    kw, kb = jax.random.split(key)
    bound = 1.0 / jnp.sqrt(jnp.float32(IN))
    weight = jax.random.uniform(kw, (OUT, IN), jnp.float32, -bound, bound)
    bias = jax.random.uniform(kb, (OUT,), jnp.float32, -bound, bound)
    return weight, bias


if __name__ == "__main__":
    key = jax.random.PRNGKey(0)
    k_x, k_p = jax.random.split(key)
    x1 = jax.random.normal(k_x, (N, IN), jnp.float32)
    weight, bias = init_params(k_p)

    w_aug = fold_params(weight, bias)  # one-time init-side fold (2 DMAs/call, not 3)

    out = model_forward(x1, w_aug)
    out = jax.block_until_ready(out)

    # Sanity check against plain-JAX reference.
    ref = (x1 @ weight.T + bias)[None, ...]
    assert out.shape == (1, N, OUT), out.shape
    assert jnp.allclose(out, ref, atol=1e-5, rtol=1e-5)

    print("KERNEL_OK")
</pallas_src>

<mosaic_0001>
module attributes {stable_mosaic.version = 11 : i64} {
  func.func @_linear_kernel(%arg0: memref<8x3xf32, #tpu.memory_space<vmem>>, %arg1: memref<4x8xf32, #tpu.memory_space<vmem>>, %arg2: memref<8x8xf32, #tpu.memory_space<vmem>>) attributes {dimension_semantics = [], scalar_prefetch = 0 : i64, scratch_operands = 0 : i64, tpu.core_type = #tpu.core_type<tc>} {
    %c0 = arith.constant 0 : index
    %c0_0 = arith.constant 0 : index
    %0 = vector.load %arg0[%c0, %c0_0] : memref<8x3xf32, #tpu.memory_space<vmem>>, vector<8x3xf32>
    %c0_1 = arith.constant 0 : index
    %c0_2 = arith.constant 0 : index
    %1 = vector.load %arg1[%c0_1, %c0_2] : memref<4x8xf32, #tpu.memory_space<vmem>>, vector<4x8xf32>
    %2 = vector.extract_strided_slice %1 {offsets = [3, 0], sizes = [1, 8], strides = [1, 1]} : vector<4x8xf32> to vector<1x8xf32>
    %3 = vector.shape_cast %2 : vector<1x8xf32> to vector<1x8xf32>
    %4 = vector.broadcast %3 : vector<1x8xf32> to vector<8x8xf32>
    %5 = vector.extract_strided_slice %0 {offsets = [0, 0], sizes = [8, 1], strides = [1, 1]} : vector<8x3xf32> to vector<8x1xf32>
    %6 = vector.extract_strided_slice %1 {offsets = [0, 0], sizes = [1, 8], strides = [1, 1]} : vector<4x8xf32> to vector<1x8xf32>
    %7 = vector.broadcast %5 : vector<8x1xf32> to vector<8x8xf32>
    %8 = vector.broadcast %6 : vector<1x8xf32> to vector<8x8xf32>
    %9 = arith.mulf %7, %8 : vector<8x8xf32>
    %10 = arith.addf %4, %9 : vector<8x8xf32>
    %11 = vector.extract_strided_slice %0 {offsets = [0, 1], sizes = [8, 1], strides = [1, 1]} : vector<8x3xf32> to vector<8x1xf32>
    %12 = vector.extract_strided_slice %1 {offsets = [1, 0], sizes = [1, 8], strides = [1, 1]} : vector<4x8xf32> to vector<1x8xf32>
    %13 = vector.broadcast %11 : vector<8x1xf32> to vector<8x8xf32>
    %14 = vector.broadcast %12 : vector<1x8xf32> to vector<8x8xf32>
    %15 = arith.mulf %13, %14 : vector<8x8xf32>
    %16 = arith.addf %10, %15 : vector<8x8xf32>
    %17 = vector.extract_strided_slice %0 {offsets = [0, 2], sizes = [8, 1], strides = [1, 1]} : vector<8x3xf32> to vector<8x1xf32>
    %18 = vector.extract_strided_slice %1 {offsets = [2, 0], sizes = [1, 8], strides = [1, 1]} : vector<4x8xf32> to vector<1x8xf32>
    %19 = vector.broadcast %17 : vector<8x1xf32> to vector<8x8xf32>
    %20 = vector.broadcast %18 : vector<1x8xf32> to vector<8x8xf32>
    %21 = arith.mulf %19, %20 : vector<8x8xf32>
    %22 = arith.addf %16, %21 : vector<8x8xf32>
    %c0_3 = arith.constant 0 : index
    %c0_4 = arith.constant 0 : index
    %23 = vector.load %arg2[%c0_3, %c0_4] : memref<8x8xf32, #tpu.memory_space<vmem>>, vector<8x8xf32>
    tpu.vector_store %arg2[%c0_3, %c0_4], %22 {strides = array<i32>} : memref<8x8xf32, #tpu.memory_space<vmem>>, vector<8x8xf32>,
    return
  }
}

</mosaic_0001>

<bundles_post_ra>
// kernel: tpu_custom_call.1
= control target key start
LH: loop header
LB: loop body
LE: loop exit
PB: predicated region body
PF: predicated region fallthrough
CT: control target
= control target key end

     0   :  { %v95_v1 = vmov 0   ;;  %v96_v2 = vmov 2   ;;  %s123_s0 = inlined_call_operand.vmem [shape: f32[8,3], index: 0, kind: input, shape index: {}]   ;;  %s124_s1 = inlined_call_operand.vmem [shape: f32[4,8], index: 1, kind: input, shape index: {}]   ;;  %s125_s2 = inlined_call_operand.hbm [shape: f32[8,8], index: 2, kind: output, shape index: {}]  }
   0x1   :  { %v12_v0 = vld [vmem:[%s123_s0] sm:$0xff]  ;;  %69 = vset.pattern.permute.xlu0 %v95_v1  ;;  %71 = vset.pattern.permute.xlu1 %v96_v2 }
   0x2   :  { %7 = vsyncpa [#allocation3], 0  ;;  %20 = vperm.xlu0 %69, %v12_v0   ;;  %40 = vperm.xlu1 %71, %v12_v0   ;;  %v97_v3 = vmov 1   ;;  %v14_v4 = vlaneseq  ;;  %v13_v7 = vld [vmem:[%s124_s1] sm:$0xf]  ;;  %s98_s0 = smov [#allocation2]  }
   0x3   :  { %s57_s13 = sshll.u32 %s98_s0, 4  ;;  %vm49_vm0 = vcmask 64512   ;;  %s58_s13 = int_to_ptr.vmem [resolvable:$true] %s57_s13 }
   0x4   :  { %v15_v5 = vshrl.u32 %v14_v4, 7  ;;  %s73_s1 = scalar_lea.vmem %s58_s13, 128  ;;  %p78_p1 = scmp.lt.s32.totalorder %s58_s13, %s58_s13 }
   0x5   :  { %p74_p0 = scmp.ne.s32.totalorder %s58_s13, %s73_s1  ;;  %p79_p2 = scmp.lt.s32.totalorder %s73_s1, %s73_s1 }
   0x6   :  { %70 = vset.pattern.permute.xlu0 %v97_v3  ;;  %v25_v6 = vsub.s32 0, %v15_v5  ;;  %v16_v8 = vsub.s32 3, %v15_v5  ;;  %v35_v10 = vsub.s32 1, %v15_v5  ;;  %v45_v11 = vsub.s32 2, %v15_v5 }
   0x7   :  { %30 = vperm.xlu0 %70, %v12_v0   ;;  %p80_p3 = por %p79_p2, %p78_p1 }
   0x8   :  { %v26_v9 = vrot.slane %v13_v7, %v25_v6  ;;  %v17_v13 = vrot.slane %v13_v7, %v16_v8  ;;  %v36_v15 = vrot.slane %v13_v7, %v35_v10  ;;  %v46_v16 = vrot.slane %v13_v7, %v45_v11 }
   0x9   :  { %p81_p4 = pnand %p80_p3, %p74_p0 }
   0xb   :  { %72 = vset.pattern.permute.xlu0 %v96_v2 }
  0x7d   :  { %v21_v12 = vpop.permute.xlu0 %20  ;;  %v41_v17 = vpop.permute.xlu1 %40 }
  0x7e   :  { %v27_v14 = vmul.f32 %v26_v9, %v21_v12  ;;  %v47_v21 = vmul.f32 %v46_v16, %v41_v17 }
  0x80   :  { %v28_v19 = vadd.f32 %v27_v14, %v17_v13 }
  0x82   :  { %v31_v18 = vpop.permute.xlu0 %30 }
  0x83   :  { %v37_v20 = vmul.f32 %v36_v15, %v31_v18 }
  0x85   :  { %v38_v22 = vadd.f32 %v37_v20, %v28_v19 }
  0x87   :  { %v48_v23 = vadd.f32 %v47_v21, %v38_v22 }
  0x89   :  { %50 = vst.msk [vmem:[#allocation2] sm:$0xff] %vm49_vm0, %v48_v23 }
  0x8a   :  { %84 = shalt.err (!%p81_p4)
}
  0x8b   :  { %60 = dma.vmem_to_hbm [thread:$0]  %s58_s13, 128, %s125_s2, [#allocation3]  }
  0x8c   :  { %93 = dma.done.wait [#allocation3], 128  }
  0x8d   :  { %94 = vsyncadd [#allocation3], 4294967168 }
  0x8e   :  { %64 = vsyncpa [#allocation3], 1 }

</bundles_post_ra>
